<compile_context>
chip_gen: v7x
topology: tpu7x:2x2x1
jax: 0.10.0
libtpu: 0.0.40
codegen_flags: <defaults>
</compile_context>

<pallas_src>
import functools

import jax
import jax.numpy as jnp
from jax.experimental import pallas as pl
from jax.experimental.pallas import tpu as pltpu

BN_EPS = 1e-5
LANE = 128      # lane width (last-dim tiling)
SUBLANE = 8     # sublane width (second-to-last dim tiling)


def _round_up(x, m):
    return (x + m - 1) // m * m


# --------------------------------------------------------------------------- #
# Fused kernel: all encoder layers in one body, activations stay in VMEM.
# refs = (x_ref, w0, b0, w1, b1, ..., o_ref)
# --------------------------------------------------------------------------- #
def _fused_encoder_kernel(*refs, num_layers):
    x_ref = refs[0]
    o_ref = refs[-1]
    h = x_ref[...]                                           # (tile_n, f_in_pad) f32
    for l in range(num_layers):                              # static unroll over layers
        w_ref = refs[1 + 2 * l]                              # (in_pad, out_pad) bf16
        b_ref = refs[2 + 2 * l]                              # (1, out_pad)      f32
        y = jnp.dot(h.astype(jnp.bfloat16), w_ref[...],
                    preferred_element_type=jnp.float32) + b_ref[...]
        h = y * jax.nn.sigmoid(y)                            # SiLU in f32 (sigmoid on EUP)
    o_ref[...] = h.astype(o_ref.dtype)


# --------------------------------------------------------------------------- #
# One-time parameter preparation: fold BN into Linear, pad per-layer, cast to bf16.
# --------------------------------------------------------------------------- #
def prepare_params(params):
    w_list, b_list = [], []
    for (w, b, gamma, beta, rmean, rvar) in params:
        f_out, f_in = w.shape
        in_pad = _round_up(f_in, LANE)
        out_pad = _round_up(f_out, LANE)
        scale = gamma * jax.lax.rsqrt(rvar + BN_EPS)         # (F_out,)
        wt = (w.T * scale[None, :]).astype(jnp.float32)      # (F_in, F_out), BN folded
        bf = ((b - rmean) * scale + beta).astype(jnp.float32)
        # Zero padding is exact: padded input cols hit zero weight rows; padded output
        # cols get y = 0 -> SiLU(0) = 0 -> ignored (zero rows) by the next layer.
        w_pad = jnp.zeros((in_pad, out_pad), jnp.bfloat16)
        w_pad = w_pad.at[:f_in, :f_out].set(wt.astype(jnp.bfloat16))
        b_pad = jnp.zeros((1, out_pad), jnp.float32).at[0, :f_out].set(bf)
        w_list.append(w_pad)
        b_list.append(b_pad)
    return tuple(w_list), tuple(b_list)


# --------------------------------------------------------------------------- #
# Forward pass: single pallas_call over a batch grid (jitted so the pad of x
# and the final slice fuse with the kernel instead of extra HBM round-trips).
# --------------------------------------------------------------------------- #
@functools.partial(jax.jit, static_argnames=("f_out", "block_rows"))
def encoder_forward(w_list, b_list, x, *, f_out, block_rows=512):
    num_layers = len(w_list)
    n, f_in = x.shape
    f_in_pad = w_list[0].shape[0]
    f_out_pad = w_list[-1].shape[1]

    # Batch tiling: force multiple of 8, cap by the (padded) batch.
    block_rows = max(SUBLANE, _round_up(int(block_rows), SUBLANE))
    tile_n = min(block_rows, _round_up(n, SUBLANE))
    n_pad = _round_up(n, tile_n)
    # Keep >=2 grid steps when rows permit so the "parallel" axis can span both
    # TensorCores on v7x (costs only ~0.35us of extra step overhead on 1-TC chips).
    if n_pad // tile_n < 2 and n_pad >= 2 * SUBLANE:
        tile_n = _round_up((n_pad + 1) // 2, SUBLANE)
        n_pad = _round_up(n, tile_n)
    grid = (n_pad // tile_n,)

    # Pad input (fused by XLA under jit). Padded rows/cols are zero -> exact results.
    x_p = jnp.zeros((n_pad, f_in_pad), jnp.float32).at[:n, :f_in].set(x.astype(jnp.float32))

    # VMEM sizing: double-buffered x/out tiles + single-buffered bf16 weights + f32 biases.
    w_bytes = sum(int(w.size) * 2 for w in w_list)
    b_bytes = sum(int(b.size) * 4 for b in b_list)
    io_bytes = 2 * tile_n * f_in_pad * 4 + 2 * tile_n * f_out_pad * 4
    required = w_bytes + b_bytes + io_bytes + (4 << 20)
    try:
        cap = int(getattr(pltpu.get_tpu_info(), "vmem_capacity_bytes", 128 << 20))
    except Exception:  # pragma: no cover - conservative fallback
        cap = 64 << 20
    vmem_limit = min(max(required, 32 << 20), int(0.9 * cap))
    vmem_limit = int(max(vmem_limit, required))   # never clamp below the actual need

    # BlockSpecs: x/out tiled over the batch grid; weights/biases VMEM-resident,
    # constant index_map, single-buffered (no re-DMA across grid steps).
    in_specs = [pl.BlockSpec((tile_n, f_in_pad), lambda i: (i, 0))]
    flat_params = []
    for w, b in zip(w_list, b_list):
        in_specs.append(pl.BlockSpec(w.shape, lambda i: (0, 0),
                                     pipeline_mode=pl.Buffered(1)))
        in_specs.append(pl.BlockSpec(b.shape, lambda i: (0, 0),
                                     pipeline_mode=pl.Buffered(1)))
        flat_params.extend((w, b))

    out = pl.pallas_call(
        functools.partial(_fused_encoder_kernel, num_layers=num_layers),
        out_shape=jax.ShapeDtypeStruct((n_pad, f_out_pad), jnp.float32),
        grid_spec=pltpu.PrefetchScalarGridSpec(
            num_scalar_prefetch=0,
            grid=grid,
            in_specs=in_specs,
            out_specs=pl.BlockSpec((tile_n, f_out_pad), lambda i: (i, 0)),
        ),
        compiler_params=pltpu.CompilerParams(
            dimension_semantics=("parallel",),     # batch tiles across TCs on v7x
            vmem_limit_bytes=vmem_limit,
        ),
    )(x_p, *flat_params)

    return out[:n, :f_out]


# --------------------------------------------------------------------------- #
# Parameter init matching PyTorch defaults, and a pure-JAX reference.
# --------------------------------------------------------------------------- #
def init_encoder_params(key, dimensions):
    """Linear: U(-1/sqrt(fan_in), +1/sqrt(fan_in)); BN: gamma=1, beta=0, mean=0, var=1."""
    params = []
    for f_in, f_out in zip(dimensions[:-1], dimensions[1:]):
        key, kw, kb = jax.random.split(key, 3)
        bound = 1.0 / (f_in ** 0.5)
        w = jax.random.uniform(kw, (f_out, f_in), jnp.float32, -bound, bound)
        b = jax.random.uniform(kb, (f_out,), jnp.float32, -bound, bound)
        gamma = jnp.ones((f_out,), jnp.float32)
        beta = jnp.zeros((f_out,), jnp.float32)
        rmean = jnp.zeros((f_out,), jnp.float32)
        rvar = jnp.ones((f_out,), jnp.float32)
        params.append((w, b, gamma, beta, rmean, rvar))
    return params


def encoder_reference(params, x):
    """Pure-JAX f32 reference of the eval-mode PyTorch forward pass (unfused, unpadded)."""
    out = x.astype(jnp.float32)
    for (w, b, gamma, beta, rmean, rvar) in params:
        y = out @ w.T + b
        y = (y - rmean) / jnp.sqrt(rvar + BN_EPS) * gamma + beta
        out = y * jax.nn.sigmoid(y)
    return out


if __name__ == "__main__":
    # Small shapes consistent with the module (spec input is (N, 20)).
    batch = 64
    dimensions = [20, 64, 32]

    key = jax.random.PRNGKey(0)
    key, kx = jax.random.split(key)
    x = jax.random.normal(kx, (batch, dimensions[0]), jnp.float32)

    params = init_encoder_params(key, dimensions)
    w_list, b_list = prepare_params(params)

    out = encoder_forward(w_list, b_list, x, f_out=dimensions[-1], block_rows=512)
    out = jax.block_until_ready(out)

    ref = encoder_reference(params, x)
    assert out.shape == (batch, dimensions[-1])
    # bf16 weights/activations on the MXU (f32 accumulate): allow bf16-level tolerance.
    max_err = float(jnp.max(jnp.abs(out - ref)))
    assert jnp.allclose(out, ref, atol=3e-2, rtol=3e-2), f"mismatch vs reference (max abs err {max_err})"

    print("KERNEL_OK")
</pallas_src>

<mosaic_0001>
module attributes {stable_mosaic.version = 11 : i64} {
  func.func @_fused_encoder_kernel(%arg0: i32, %arg1: memref<32x128xf32, #tpu.memory_space<vmem>>, %arg2: memref<128x128xbf16, #tpu.memory_space<vmem>>, %arg3: memref<1x128xf32, #tpu.memory_space<vmem>>, %arg4: memref<128x128xbf16, #tpu.memory_space<vmem>>, %arg5: memref<1x128xf32, #tpu.memory_space<vmem>>, %arg6: memref<32x128xf32, #tpu.memory_space<vmem>>) attributes {dimension_semantics = [#tpu.dimension_semantics<parallel>], iteration_bounds = array<i64: 2>, scalar_prefetch = 0 : i64, scratch_operands = 0 : i64, tpu.core_type = #tpu.core_type<tc>, window_params = [{transform_indices = @transform_0, window_bounds = array<i64: 32, 128>}, {pipeline_mode = #tpu.pipeline_mode<synchronous>, transform_indices = @transform_1, window_bounds = array<i64: 128, 128>}, {pipeline_mode = #tpu.pipeline_mode<synchronous>, transform_indices = @transform_2, window_bounds = array<i64: 1, 128>}, {pipeline_mode = #tpu.pipeline_mode<synchronous>, transform_indices = @transform_3, window_bounds = array<i64: 128, 128>}, {pipeline_mode = #tpu.pipeline_mode<synchronous>, transform_indices = @transform_4, window_bounds = array<i64: 1, 128>}, {transform_indices = @transform_5, window_bounds = array<i64: 32, 128>}]} {
    %c0 = arith.constant 0 : index
    %c0_0 = arith.constant 0 : index
    %0 = vector.load %arg1[%c0, %c0_0] : memref<32x128xf32, #tpu.memory_space<vmem>>, vector<32x128xf32>
    %1 = arith.truncf %0 : vector<32x128xf32> to vector<32x128xbf16>
    %c0_1 = arith.constant 0 : index
    %c0_2 = arith.constant 0 : index
    %2 = vector.load %arg2[%c0_1, %c0_2] : memref<128x128xbf16, #tpu.memory_space<vmem>>, vector<128x128xbf16>
    %cst = arith.constant dense<0.000000e+00> : vector<32x128xf32>
    %3 = tpu.matmul %1, %2, %cst {dimension_numbers = #tpu.dot_dimension_numbers<[1], [0], [0], [1], [0, 0, 1, 1], [], []>} : vector<32x128xbf16>, vector<128x128xbf16>, vector<32x128xf32> -> vector<32x128xf32>
    %c0_3 = arith.constant 0 : index
    %c0_4 = arith.constant 0 : index
    %4 = vector.load %arg3[%c0_3, %c0_4] : memref<1x128xf32, #tpu.memory_space<vmem>>, vector<1x128xf32>
    %5 = vector.broadcast %4 : vector<1x128xf32> to vector<32x128xf32>
    %6 = arith.addf %3, %5 : vector<32x128xf32>
    %7 = arith.negf %6 : vector<32x128xf32>
    %8 = math.exp %7 : vector<32x128xf32>
    %cst_5 = arith.constant 1.000000e+00 : f32
    %9 = vector.broadcast %cst_5 : f32 to vector<32x128xf32>
    %10 = arith.addf %9, %8 : vector<32x128xf32>
    %11 = arith.divf %9, %10 : vector<32x128xf32>
    %12 = arith.mulf %6, %11 : vector<32x128xf32>
    %13 = arith.truncf %12 : vector<32x128xf32> to vector<32x128xbf16>
    %c0_6 = arith.constant 0 : index
    %c0_7 = arith.constant 0 : index
    %14 = vector.load %arg4[%c0_6, %c0_7] : memref<128x128xbf16, #tpu.memory_space<vmem>>, vector<128x128xbf16>
    %cst_8 = arith.constant dense<0.000000e+00> : vector<32x128xf32>
    %15 = tpu.matmul %13, %14, %cst_8 {dimension_numbers = #tpu.dot_dimension_numbers<[1], [0], [0], [1], [0, 0, 1, 1], [], []>} : vector<32x128xbf16>, vector<128x128xbf16>, vector<32x128xf32> -> vector<32x128xf32>
    %c0_9 = arith.constant 0 : index
    %c0_10 = arith.constant 0 : index
    %16 = vector.load %arg5[%c0_9, %c0_10] : memref<1x128xf32, #tpu.memory_space<vmem>>, vector<1x128xf32>
    %17 = vector.broadcast %16 : vector<1x128xf32> to vector<32x128xf32>
    %18 = arith.addf %15, %17 : vector<32x128xf32>
    %19 = arith.negf %18 : vector<32x128xf32>
    %20 = math.exp %19 : vector<32x128xf32>
    %cst_11 = arith.constant 1.000000e+00 : f32
    %21 = vector.broadcast %cst_11 : f32 to vector<32x128xf32>
    %22 = arith.addf %21, %20 : vector<32x128xf32>
    %23 = arith.divf %21, %22 : vector<32x128xf32>
    %24 = arith.mulf %18, %23 : vector<32x128xf32>
    %c0_12 = arith.constant 0 : index
    %c0_13 = arith.constant 0 : index
    %25 = vector.load %arg6[%c0_12, %c0_13] : memref<32x128xf32, #tpu.memory_space<vmem>>, vector<32x128xf32>
    tpu.vector_store %arg6[%c0_12, %c0_13], %24 {strides = array<i32>} : memref<32x128xf32, #tpu.memory_space<vmem>>, vector<32x128xf32>,
    return
  }
  func.func @transform_0(%arg0: i32) -> (i32, i32) {
    %c0_i32 = arith.constant 0 : i32
    %c0_i32_0 = arith.constant 0 : i32
    return %arg0, %c0_i32 : i32, i32
  }
  func.func @transform_1(%arg0: i32) -> (i32, i32) {
    %c0_i32 = arith.constant 0 : i32
    %c0_i32_0 = arith.constant 0 : i32
    %c0_i32_1 = arith.constant 0 : i32
    return %c0_i32, %c0_i32_0 : i32, i32
  }
  func.func @transform_2(%arg0: i32) -> (i32, i32) {
    %c0_i32 = arith.constant 0 : i32
    %c0_i32_0 = arith.constant 0 : i32
    %c0_i32_1 = arith.constant 0 : i32
    return %c0_i32, %c0_i32_0 : i32, i32
  }
  func.func @transform_3(%arg0: i32) -> (i32, i32) {
    %c0_i32 = arith.constant 0 : i32
    %c0_i32_0 = arith.constant 0 : i32
    %c0_i32_1 = arith.constant 0 : i32
    return %c0_i32, %c0_i32_0 : i32, i32
  }
  func.func @transform_4(%arg0: i32) -> (i32, i32) {
    %c0_i32 = arith.constant 0 : i32
    %c0_i32_0 = arith.constant 0 : i32
    %c0_i32_1 = arith.constant 0 : i32
    return %c0_i32, %c0_i32_0 : i32, i32
  }
  func.func @transform_5(%arg0: i32) -> (i32, i32) {
    %c0_i32 = arith.constant 0 : i32
    %c0_i32_0 = arith.constant 0 : i32
    return %arg0, %c0_i32 : i32, i32
  }
}

</mosaic_0001>

<bundles_post_ra>
// kernel: encoder_forward.1
= control target key start
LH: loop header
LB: loop body
LE: loop exit
PB: predicated region body
PF: predicated region fallthrough
CT: control target
= control target key end

     0   :  { %s784_s18 = smov 0   ;;  %s862_s0 = inlined_call_operand.vmem [shape: f32[64,128], index: 0, kind: input, shape index: {}]   ;;  %s863_s1 = inlined_call_operand.vmem [shape: bf16[128,128], index: 1, kind: input, shape index: {}]   ;;  %s864_s2 = inlined_call_operand.vmem [shape: f32[1,128], index: 2, kind: input, shape index: {}]   ;;  %s865_s3 = inlined_call_operand.vmem [shape: bf16[128,128], index: 3, kind: input, shape index: {}]   ;;  %s866_s4 = inlined_call_operand.vmem [shape: f32[1,128], index: 4, kind: input, shape index: {}]   ;;  %s867_s5 = inlined_call_operand.vmem [shape: f32[64,128], index: 5, kind: output, shape index: {}]  }
   0x1 LB: > { %s593_s19 = sadd.s32 4294967295, %s752_s18   ;;  %p597_p0 = scmp.ge.s32.totalorder %s752_s18, 1  ;;  %s752_s18 = sphi %s784_s18, %s15_s18  }
   0x2   : > { %p188_p1 = scmp.lt.s32.totalorder %s752_s18, 3 }
   0x4   : > { %p189_p2 = pnand %p597_p0, %p188_p1 }
   0x5   : > { %v698_v0 = vld [vmem:[%s863_s1] sm:$0xff] (!%p189_p2)   ;;  %s598_s22 = sshll.u32 (!%p189_p2), %s593_s19, 2  ;;  %v699_v1 = vld [vmem:[%s863_s1 + $0x8] sm:$0xff] (!%p189_p2)   ;;  %v700_v2 = vld [vmem:[%s863_s1 + $0x10] sm:$0xff] (!%p189_p2)  }
   0x6   : > { %192 = sbr.rel (%p189_p2) target bundleno = 532 (0x214), region = 40  ;;  %p217_p3 = scmp.lt.s32.totalorder (!%p189_p2), %s598_s22, 7  ;;  %650 = vmatprep.subr.bf16.mxu0 (!%p189_p2), %v698_v0  ;;  %v701_v3 = vld [vmem:[%s863_s1 + $0x18] sm:$0xff] (!%p189_p2)   ;;  %v702_v7 = vld [vmem:[%s863_s1 + $0x20] sm:$0xff] (!%p189_p2)   ;;  %v703_v8 = vld [vmem:[%s863_s1 + $0x28] sm:$0xff] (!%p189_p2)  }
   0x7   : > { %651 = vmatpush3.bf16.msra.mxu0 (!%p189_p2), %v698_v0  ;;  %v704_v9 = vld [vmem:[%s863_s1 + $0x30] sm:$0xff] (!%p189_p2)   ;;  %v705_v10 = vld [vmem:[%s863_s1 + $0x38] sm:$0xff] (!%p189_p2)   ;;  %v706_v14 = vld [vmem:[%s865_s3] sm:$0xff] (!%p189_p2)  }
   0x8   : > { %652 = vmatprep.subr.bf16.mxu0 (!%p189_p2), %v699_v1  ;;  %670 = vmatprep.subr.bf16.mxu1 (!%p189_p2), %v706_v14  ;;  %v707_v15 = vld [vmem:[%s865_s3 + $0x8] sm:$0xff] (!%p189_p2)   ;;  %v708_v16 = vld [vmem:[%s865_s3 + $0x10] sm:$0xff] (!%p189_p2)   ;;  %v709_v17 = vld [vmem:[%s865_s3 + $0x18] sm:$0xff] (!%p189_p2)  }
   0x9   : > { %671 = vmatpush3.bf16.msra.mxu1 (!%p189_p2), %v706_v14  ;;  %v710_v18 = vld [vmem:[%s865_s3 + $0x20] sm:$0xff] (!%p189_p2)   ;;  %v711_v19 = vld [vmem:[%s865_s3 + $0x28] sm:$0xff] (!%p189_p2)   ;;  %v712_v20 = vld [vmem:[%s865_s3 + $0x30] sm:$0xff] (!%p189_p2)  }
   0xa   : > { %672 = vmatprep.subr.bf16.mxu1 (!%p189_p2), %v707_v15  ;;  %v713_v21 = vld [vmem:[%s865_s3 + $0x38] sm:$0xff] (!%p189_p2)   ;;  %v602_v22 = vld [vmem:[%s864_s2] ss:$0 sm:$0xff] (!%p189_p2) }
   0xb   : > { %653 = vmatpush3.bf16.msra.mxu0 (!%p189_p2), %v699_v1  ;;  %v615_v53 = vld [vmem:[%s866_s4] ss:$0 sm:$0xff] (!%p189_p2) }
   0xc   : > { %654 = vmatprep.subr.bf16.mxu0 (!%p189_p2), %v700_v2 }
   0xd   : > { %s869_s22 = smov (!%p217_p3, %s598_s22), 7  ;;  %673 = vmatpush3.bf16.msra.mxu1 %v707_v15 }
   0xe   : > { %s599_s27 = sshll.u32 %s869_s22, 3  ;;  %674 = vmatprep.subr.bf16.mxu1 %v708_v16 }
   0xf   : > { %s220_s30 = scalar_lea.vmem %s862_s0, %s599_s27  ;;  %655 = vmatpush3.bf16.msra.mxu0 %v700_v2  ;;  %s226_s16 = scalar_lea.vmem %s867_s5, %s599_s27 }
  0x10   : > { %v229_v4 = vld [vmem:[%s220_s30] sm:$0xff]  ;;  %v230_v5 = vld [vmem:[%s220_s30 + $0x8] sm:$0xff]  ;;  %656 = vmatprep.subr.bf16.mxu0 %v701_v3  ;;  %v231_v11 = vld [vmem:[%s220_s30 + $0x10] sm:$0xff] }
  0x11   : > { %v233_v6 = vpack.c.bf16 %v230_v5, %v229_v4  ;;  %v232_v12 = vld [vmem:[%s220_s30 + $0x18] sm:$0xff]  ;;  %675 = vmatpush3.bf16.msra.mxu1 %v708_v16 }
  0x12   : > { %v234_v13 = vpack.c.bf16 %v232_v12, %v231_v11  ;;  %676 = vmatprep.subr.bf16.mxu1 %v709_v17 }
  0x13   : > { %666 = vmatprep.mubr.bf16.mxu0 %v233_v6  ;;  %657 = vmatpush3.bf16.msra.mxu0 %v701_v3 }
  0x14   : > { %658 = vmatprep.subr.bf16.mxu0 %v702_v7 }
  0x15   : > { %677 = vmatpush3.bf16.msra.mxu1 %v709_v17 }
  0x16   : > { %678 = vmatprep.subr.bf16.mxu1 %v710_v18 }
  0x17   : > { %659 = vmatpush3.bf16.msra.mxu0 %v702_v7 }
  0x18   : > { %660 = vmatprep.subr.bf16.mxu0 %v703_v8 }
  0x19   : > { %679 = vmatpush3.bf16.msra.mxu1 %v710_v18 }
  0x1a   : > { %680 = vmatprep.subr.bf16.mxu1 %v711_v19 }
  0x1b   : > { %661 = vmatpush3.bf16.msra.mxu0 %v703_v8 }
  0x1c   : > { %662 = vmatprep.subr.bf16.mxu0 %v704_v9 }
  0x1d   : > { %681 = vmatpush3.bf16.msra.mxu1 %v711_v19 }
  0x1e   : > { %682 = vmatprep.subr.bf16.mxu1 %v712_v20 }
  0x1f   : > { %663 = vmatpush3.bf16.msra.mxu0 %v704_v9 }
  0x20   : > { %664 = vmatprep.subr.bf16.mxu0 %v705_v10 }
  0x21   : > { %683 = vmatpush3.bf16.msra.mxu1 %v712_v20 }
  0x22   : > { %684 = vmatprep.subr.bf16.mxu1 %v713_v21 }
  0x23   : > { %665 = vmatpush3.bf16.msra.mxu0 %v705_v10 }
  0x25   : > { %685 = vmatpush3.bf16.msra.mxu1 %v713_v21 }
  0x26   : > { %667 = vmatmul.mubr.bf16.vlgmr.msra.gmra.mrb[0].mxu0 %v234_v13 }
  0xf9   : > { %v668_v23 = vpop.f32.mrb[0].mxu0 }
  0xfa   : > { %v349_v24 = vadd.f32 %v668_v23, %v602_v22  ;;  %v340_v25 = vpop.f32.mrb[1].mxu0 }
  0xfb   : > { %v341_v26 = vadd.f32 %v602_v22, %v340_v25  ;;  %v669_v27 = vpop.f32.mrb[2].mxu0 }
  0xfc   : > { %v613_v28 = vmul.f32 -1.442695, %v349_v24  ;;  %v352_v29 = vadd.f32 %v669_v27, %v602_v22  ;;  %v343_v30 = vpop.f32.mrb[3].mxu0 }
  0xfd   : > { %v611_v31 = vmul.f32 -1.442695, %v341_v26  ;;  %v344_v32 = vadd.f32 %v602_v22, %v343_v30 }
  0xfe   : > { %714 = vpow2.f32 %v613_v28  ;;  %v614_v33 = vmul.f32 -1.442695, %v352_v29 }
  0xff   : > { %716 = vpow2.f32 %v611_v31  ;;  %v612_v34 = vmul.f32 -1.442695, %v344_v32 }
 0x100   : > { %718 = vpow2.f32 %v614_v33 }
 0x101   : > { %720 = vpow2.f32 %v612_v34 }
 0x108   : > { %v715_v35 = vpop.eup %714 }
 0x109   : > { %v717_v36 = vpop.eup %716  ;;  %v369_v37 = vadd.f32 1.0, %v715_v35 }
 0x10a   : > { %v719_v38 = vpop.eup %718  ;;  %v367_v39 = vadd.f32 1.0, %v717_v36 }
 0x10b   : > { %v721_v40 = vpop.eup %720  ;;  %722 = vrcp.f32 %v369_v37  ;;  %v370_v41 = vadd.f32 1.0, %v719_v38 }
 0x10c   : > { %724 = vrcp.f32 %v367_v39  ;;  %v368_v42 = vadd.f32 1.0, %v721_v40 }
 0x10d   : > { %726 = vrcp.f32 %v370_v41 }
 0x10e   : > { %728 = vrcp.f32 %v368_v42 }
 0x115   : > { %v723_v43 = vpop.eup %722 }
 0x116   : > { %v725_v44 = vpop.eup %724  ;;  %v381_v47 = vmul.f32 %v723_v43, %v349_v24 }
 0x117   : > { %v727_v45 = vpop.eup %726  ;;  %v379_v49 = vmul.f32 %v725_v44, %v341_v26 }
 0x118   : > { %v729_v46 = vpop.eup %728  ;;  %v382_v48 = vmul.f32 %v727_v45, %v352_v29 }
 0x119   : > { %v380_v50 = vmul.f32 %v729_v46, %v344_v32 }
 0x11a   : > { %v384_v51 = vpack.c.bf16 %v382_v48, %v381_v47 }
 0x11b   : > { %v383_v52 = vpack.c.bf16 %v380_v50, %v379_v49 }
 0x11d   : > { %686 = vmatprep.mubr.bf16.mxu1 %v383_v52 }
 0x11e   : > { %687 = vmatmul.mubr.bf16.vlgmr.msra.gmra.mrb[0].mxu1 %v384_v51 }
 0x1f1   : > { %v688_v54 = vpop.f32.mrb[0].mxu1 }
 0x1f2   : > { %v499_v55 = vadd.f32 %v688_v54, %v615_v53  ;;  %v490_v56 = vpop.f32.mrb[1].mxu1 }
 0x1f3   : > { %v491_v57 = vadd.f32 %v615_v53, %v490_v56  ;;  %v689_v58 = vpop.f32.mrb[2].mxu1 }
 0x1f4   : > { %v626_v59 = vmul.f32 -1.442695, %v499_v55  ;;  %v502_v60 = vadd.f32 %v689_v58, %v615_v53  ;;  %v493_v61 = vpop.f32.mrb[3].mxu1 }
 0x1f5   : > { %v624_v62 = vmul.f32 -1.442695, %v491_v57  ;;  %v494_v63 = vadd.f32 %v615_v53, %v493_v61 }
 0x1f6   : > { %730 = vpow2.f32 %v626_v59  ;;  %v627_v0 = vmul.f32 -1.442695, %v502_v60 }
 0x1f7   : > { %732 = vpow2.f32 %v624_v62  ;;  %v625_v1 = vmul.f32 -1.442695, %v494_v63 }
 0x1f8   : > { %734 = vpow2.f32 %v627_v0 }
 0x1f9   : > { %736 = vpow2.f32 %v625_v1 }
 0x200   : > { %v731_v2 = vpop.eup %730 }
 0x201   : > { %v733_v3 = vpop.eup %732  ;;  %v519_v4 = vadd.f32 1.0, %v731_v2 }
 0x202   : > { %v735_v5 = vpop.eup %734  ;;  %v517_v6 = vadd.f32 1.0, %v733_v3 }
 0x203   : > { %v737_v7 = vpop.eup %736  ;;  %738 = vrcp.f32 %v519_v4  ;;  %v520_v8 = vadd.f32 1.0, %v735_v5 }
 0x204   : > { %740 = vrcp.f32 %v517_v6  ;;  %v518_v9 = vadd.f32 1.0, %v737_v7 }
 0x205   : > { %742 = vrcp.f32 %v520_v8 }
 0x206   : > { %744 = vrcp.f32 %v518_v9 }
 0x20d   : > { %v739_v10 = vpop.eup %738 }
 0x20e   : > { %v741_v11 = vpop.eup %740  ;;  %v531_v16 = vmul.f32 %v739_v10, %v499_v55 }
 0x20f   : > { %v743_v12 = vpop.eup %742  ;;  %v529_v13 = vmul.f32 %v741_v11, %v491_v57 }
 0x210   : > { %v745_v14 = vpop.eup %744  ;;  %v532_v17 = vmul.f32 %v743_v12, %v502_v60  ;;  %535 = vst [vmem:[%s226_s16 + $0x10] sm:$0xff] %v531_v16 }
 0x211   : > { %533 = vst [vmem:[%s226_s16] sm:$0xff] %v529_v13  ;;  %v530_v15 = vmul.f32 %v745_v14, %v494_v63 }
 0x212   : > { %536 = vst [vmem:[%s226_s16 + $0x18] sm:$0xff] %v532_v17 }
 0x213   : > { %534 = vst [vmem:[%s226_s16 + $0x8] sm:$0xff] %v530_v15 }
 0x214 PF: > { %s15_s18 = sadd.s32 1, %s752_s18  }
 0x215   : > { %p12_p4 = scmp.ge.s32.totalorder %s15_s18, 4  }
 0x217   :  { %14 = sbr.rel (!%p12_p4) target bundleno = 1 (0x1), region = 70 }

</bundles_post_ra>
